<compile_context>
chip_gen: v7x
topology: tpu7x:2x2x1
jax: 0.10.0
libtpu: 0.0.40
codegen_flags: <defaults>
</compile_context>

<pallas_src>
import math

import jax
import jax.numpy as jnp
from jax.experimental import pallas as pl
from jax.experimental.pallas import tpu as pltpu

LANE = 128  # lane-dense output slab width (per 128-lane vreg tile)


# ----------------------------------------------------------------------------
# Kernel: one batch block per grid step; both branches fused into two matmuls.
# ----------------------------------------------------------------------------
def _actor_critic_kernel(x_ref, w1_ref, b1_ref, w2_ref, b2_ref, wv_ref, bv_ref,
                         slab_ref, val_ref):
    # Cast the MXU operand in-kernel (no wrapper-side cast / extra HBM pass).
    x = x_ref[...].astype(w1_ref.dtype)              # (bb, obs)

    b1 = b1_ref[...]                                 # (1, 2H)   f32
    b2 = b2_ref[...]                                 # (1, SLAB) f32
    wv = wv_ref[...]                                 # (1, SLAB) f32 (critic cols only)
    bv = bv_ref[...]                                 # (1, 1)    f32

    # Fused layer 1: [actor | critic] in one MXU push, f32 accumulation.
    h1 = jnp.tanh(
        jnp.dot(x, w1_ref[...], preferred_element_type=jnp.float32) + b1)

    # Fused layer 2: block-diagonal weights zero-padded to the full slab width,
    # so h2 is already the lane-dense slab [actor | critic | zeros].
    h2 = jnp.tanh(
        jnp.dot(h1.astype(w2_ref.dtype), w2_ref[...],
                preferred_element_type=jnp.float32) + b2)         # (bb, SLAB) f32

    # Value head: full-lane VPU multiply + XLU lane reduction (wv is zero outside
    # the critic columns).  Computed in f32 BEFORE narrowing the slab dtype.
    val_ref[...] = (jnp.sum(h2 * wv, axis=-1, keepdims=True)
                    + bv).astype(val_ref.dtype)

    # One unmasked full-width (lane-dense) store of the slab.
    slab_ref[...] = h2.astype(slab_ref.dtype)


# ----------------------------------------------------------------------------
# Batch-block picker: largest block <= requested that divides B, multiple of 8,
# and (when possible) leaves >= 2 grid steps so v7x's two TCs both participate.
# ----------------------------------------------------------------------------
def _pick_block_b(B, requested):
    requested = max(8, min(requested, B))
    divs = [b for b in range(8, requested + 1, 8) if B % b == 0]
    if not divs:
        return B                      # single full block (always a legal block)
    two_step = [b for b in divs if B // b >= 2]
    return max(two_step) if two_step else max(divs)


# ----------------------------------------------------------------------------
# Wrapper: batch grid, resident weights (constant index_maps), parallel axis.
# ----------------------------------------------------------------------------
def actor_critic_forward(x, fused, *, block_b=512):
    """x: (B, obs_dim) f32. fused: dict from fuse_params().
    Returns (value (B, 1) f32, hidden_actor (B, hidden) in the MXU dtype)."""
    B, obs_dim = x.shape
    H = fused["w1"].shape[1] // 2
    slab_w = fused["w2"].shape[1]
    out_dtype = fused["w1"].dtype                 # slab dtype follows MXU dtype

    bb = _pick_block_b(B, block_b)
    grid = (B // bb,)

    const = lambda i: (0, 0)                      # weights/biases stay resident
    in_specs = [
        pl.BlockSpec((bb, obs_dim), lambda i: (i, 0)),            # x block
        pl.BlockSpec(fused["w1"].shape, const),
        pl.BlockSpec(fused["b1"].shape, const),
        pl.BlockSpec(fused["w2"].shape, const),
        pl.BlockSpec(fused["b2"].shape, const),
        pl.BlockSpec(fused["wv_pad"].shape, const),
        pl.BlockSpec(fused["bv"].shape, const),
    ]
    out_specs = (
        pl.BlockSpec((bb, slab_w), lambda i: (i, 0)),             # lane-dense slab
        pl.BlockSpec((bb, 1), lambda i: (i, 0)),                  # f32 value column
    )
    out_shape = (
        jax.ShapeDtypeStruct((B, slab_w), out_dtype),
        jax.ShapeDtypeStruct((B, 1), jnp.float32),
    )

    # Advisory cost estimate so XLA schedules the (tiny) kernel sensibly.
    flops = 2 * B * (obs_dim * 2 * H + 2 * H * slab_w + slab_w)
    transcendentals = B * (2 * H + slab_w)
    weight_bytes = sum(int(v.size) * v.dtype.itemsize for v in fused.values())
    bytes_accessed = (int(x.size) * x.dtype.itemsize
                      + B * slab_w * jnp.dtype(out_dtype).itemsize
                      + B * 4 + weight_bytes)

    slab, value = pl.pallas_call(
        _actor_critic_kernel,
        out_shape=out_shape,
        grid=grid,
        in_specs=in_specs,
        out_specs=out_specs,
        compiler_params=pltpu.CompilerParams(
            dimension_semantics=("parallel",)),
        cost_estimate=pl.CostEstimate(
            flops=flops, transcendentals=transcendentals,
            bytes_accessed=bytes_accessed),
    )(x, fused["w1"], fused["b1"], fused["w2"], fused["b2"],
      fused["wv_pad"], fused["bv"])

    hidden_actor = slab[:, :H]
    return value, hidden_actor


# ----------------------------------------------------------------------------
# Parameter init (orthogonal, gain=sqrt(2), zero bias) + fusion for the kernel.
# ----------------------------------------------------------------------------
def _orthogonal(key, rows, cols, gain):
    transpose = rows < cols
    r, c = (cols, rows) if transpose else (rows, cols)
    a = jax.random.normal(key, (r, c), dtype=jnp.float32)
    q, rmat = jnp.linalg.qr(a)
    q = q * jnp.sign(jnp.diagonal(rmat))[None, :]
    if transpose:
        q = q.T
    return gain * q                                    # (rows, cols)


def init_actor_critic_params(key, obs_dim, hidden_dim):
    gain = math.sqrt(2.0)
    ks = jax.random.split(key, 5)

    def linear(k, in_f, out_f):
        w = _orthogonal(k, out_f, in_f, gain).T        # (in, out) so x @ W
        b = jnp.zeros((1, out_f), dtype=jnp.float32)
        return w, b

    wa1, ba1 = linear(ks[0], obs_dim, hidden_dim)
    wa2, ba2 = linear(ks[1], hidden_dim, hidden_dim)
    wc1, bc1 = linear(ks[2], obs_dim, hidden_dim)
    wc2, bc2 = linear(ks[3], hidden_dim, hidden_dim)
    wv, bv = linear(ks[4], hidden_dim, 1)
    return dict(wa1=wa1, ba1=ba1, wa2=wa2, ba2=ba2,
                wc1=wc1, bc1=bc1, wc2=wc2, bc2=bc2, wv=wv, bv=bv)


def fuse_params(p, matmul_dtype=jnp.bfloat16):
    """Fuse per-branch weights for the kernel.
    Layer 1: [actor | critic] concat.  Layer 2: block-diagonal, zero-padded on
    the output dim to the lane-dense slab width.  Value-head row zero-padded to
    the slab width (nonzero only on the critic columns).  MXU operands cast to
    `matmul_dtype`; biases / value head stay f32."""
    H = p["wa2"].shape[1]
    slab_w = max(LANE, int(pl.cdiv(2 * H, LANE)) * LANE)

    w1 = jnp.concatenate([p["wa1"], p["wc1"]], axis=1)            # (obs, 2H)
    b1 = jnp.concatenate([p["ba1"], p["bc1"]], axis=1)            # (1, 2H)

    w2 = jnp.zeros((2 * H, slab_w), jnp.float32)
    w2 = w2.at[:H, :H].set(p["wa2"]).at[H:, H:2 * H].set(p["wc2"])   # (2H, SLAB)
    b2 = jnp.zeros((1, slab_w), jnp.float32)
    b2 = b2.at[:, :H].set(p["ba2"]).at[:, H:2 * H].set(p["bc2"])     # (1, SLAB)

    wv_pad = jnp.zeros((1, slab_w), jnp.float32).at[:, H:2 * H].set(p["wv"][:, 0])

    return dict(w1=w1.astype(matmul_dtype), b1=b1,
                w2=w2.astype(matmul_dtype), b2=b2,
                wv_pad=wv_pad, bv=p["bv"])


# ----------------------------------------------------------------------------
# Pure-JAX references.
# ----------------------------------------------------------------------------
def _reference_forward_f32(x, p):
    dot = lambda a, b: jnp.dot(a, b, precision=jax.lax.Precision.HIGHEST)
    ha = jnp.tanh(dot(jnp.tanh(dot(x, p["wa1"]) + p["ba1"]), p["wa2"]) + p["ba2"])
    hc = jnp.tanh(dot(jnp.tanh(dot(x, p["wc1"]) + p["bc1"]), p["wc2"]) + p["bc2"])
    return dot(hc, p["wv"]) + p["bv"], ha


def _reference_forward_fused(x, fp):
    """Same fused structure / operand dtypes as the kernel (f32 accumulation)."""
    H = fp["w1"].shape[1] // 2
    xq = x.astype(fp["w1"].dtype)
    h1 = jnp.tanh(jnp.dot(xq, fp["w1"], preferred_element_type=jnp.float32)
                  + fp["b1"])
    h2 = jnp.tanh(jnp.dot(h1.astype(fp["w2"].dtype), fp["w2"],
                          preferred_element_type=jnp.float32) + fp["b2"])
    value = jnp.sum(h2 * fp["wv_pad"], axis=-1, keepdims=True) + fp["bv"]
    return value, h2[:, :H]


if __name__ == "__main__":
    B, OBS_DIM, HIDDEN_DIM = 256, 16, 32

    key = jax.random.PRNGKey(0)
    k_params, k_x = jax.random.split(key)

    params = init_actor_critic_params(k_params, OBS_DIM, HIDDEN_DIM)
    x = jax.random.normal(k_x, (B, OBS_DIM), dtype=jnp.float32)

    # --- 1) f32 MXU operands: semantics check vs. the plain per-branch forward.
    fused_f32 = fuse_params(params, matmul_dtype=jnp.float32)
    v32, a32 = actor_critic_forward(x, fused_f32)
    v32 = jax.block_until_ready(v32)
    a32 = jax.block_until_ready(a32)
    ref_v, ref_a = _reference_forward_f32(x, params)
    assert v32.shape == (B, 1) and a32.shape == (B, HIDDEN_DIM)
    assert v32.dtype == jnp.float32
    assert jnp.allclose(v32, ref_v, atol=2e-3, rtol=2e-3)
    assert jnp.allclose(a32, ref_a, atol=2e-3, rtol=2e-3)

    # --- 2) bf16 MXU operands + bf16 slab (production config): check against a
    #        pure-JAX reference with identical fused structure / dtypes.
    fused_bf16 = fuse_params(params, matmul_dtype=jnp.bfloat16)
    value, hidden_actor = actor_critic_forward(x, fused_bf16)
    value = jax.block_until_ready(value)
    hidden_actor = jax.block_until_ready(hidden_actor)
    ref_vb, ref_ab = _reference_forward_fused(x, fused_bf16)
    assert value.shape == (B, 1) and hidden_actor.shape == (B, HIDDEN_DIM)
    assert value.dtype == jnp.float32            # critic value is exact f32 out
    assert jnp.allclose(value, ref_vb, atol=1e-2, rtol=1e-2)
    assert jnp.allclose(hidden_actor.astype(jnp.float32), ref_ab,
                        atol=2e-2, rtol=2e-2)
    # Coarse precision sanity bound vs. full-f32 semantics (intentional bf16
    # operand rounding; acceptable for PPO).
    assert jnp.max(jnp.abs(value - ref_v)) < 0.25
    assert jnp.max(jnp.abs(hidden_actor.astype(jnp.float32) - ref_a)) < 0.25

    print("KERNEL_OK")
</pallas_src>

<mosaic_0001>
module attributes {stable_mosaic.version = 11 : i64} {
  func.func @_actor_critic_kernel(%arg0: i32, %arg1: memref<128x16xf32, #tpu.memory_space<vmem>>, %arg2: memref<16x64xf32, #tpu.memory_space<vmem>>, %arg3: memref<1x64xf32, #tpu.memory_space<vmem>>, %arg4: memref<64x128xf32, #tpu.memory_space<vmem>>, %arg5: memref<1x128xf32, #tpu.memory_space<vmem>>, %arg6: memref<1x128xf32, #tpu.memory_space<vmem>>, %arg7: memref<1x1xf32, #tpu.memory_space<vmem>>, %arg8: memref<128x128xf32, #tpu.memory_space<vmem>>, %arg9: memref<128x1xf32, #tpu.memory_space<vmem>>) attributes {dimension_semantics = [#tpu.dimension_semantics<parallel>], iteration_bounds = array<i64: 2>, scalar_prefetch = 0 : i64, scratch_operands = 0 : i64, tpu.core_type = #tpu.core_type<tc>, window_params = [{transform_indices = @transform_0, window_bounds = array<i64: 128, 16>}, {pipeline_mode = #tpu.pipeline_mode<synchronous>, transform_indices = @transform_1, window_bounds = array<i64: 16, 64>}, {pipeline_mode = #tpu.pipeline_mode<synchronous>, transform_indices = @transform_2, window_bounds = array<i64: 1, 64>}, {pipeline_mode = #tpu.pipeline_mode<synchronous>, transform_indices = @transform_3, window_bounds = array<i64: 64, 128>}, {pipeline_mode = #tpu.pipeline_mode<synchronous>, transform_indices = @transform_4, window_bounds = array<i64: 1, 128>}, {pipeline_mode = #tpu.pipeline_mode<synchronous>, transform_indices = @transform_5, window_bounds = array<i64: 1, 128>}, {pipeline_mode = #tpu.pipeline_mode<synchronous>, transform_indices = @transform_6, window_bounds = array<i64: 1, 1>}, {transform_indices = @transform_7, window_bounds = array<i64: 128, 128>}, {transform_indices = @transform_8, window_bounds = array<i64: 128, 1>}]} {
    %c0 = arith.constant 0 : index
    %c0_0 = arith.constant 0 : index
    %0 = vector.load %arg1[%c0, %c0_0] : memref<128x16xf32, #tpu.memory_space<vmem>>, vector<128x16xf32>
    %c0_1 = arith.constant 0 : index
    %c0_2 = arith.constant 0 : index
    %1 = vector.load %arg3[%c0_1, %c0_2] : memref<1x64xf32, #tpu.memory_space<vmem>>, vector<1x64xf32>
    %c0_3 = arith.constant 0 : index
    %c0_4 = arith.constant 0 : index
    %2 = vector.load %arg5[%c0_3, %c0_4] : memref<1x128xf32, #tpu.memory_space<vmem>>, vector<1x128xf32>
    %c0_5 = arith.constant 0 : index
    %c0_6 = arith.constant 0 : index
    %3 = vector.load %arg6[%c0_5, %c0_6] : memref<1x128xf32, #tpu.memory_space<vmem>>, vector<1x128xf32>
    %c0_7 = arith.constant 0 : index
    %c0_8 = arith.constant 0 : index
    %4 = vector.load %arg7[%c0_7, %c0_8] : memref<1x1xf32, #tpu.memory_space<vmem>>, vector<1x1xf32>
    %c0_9 = arith.constant 0 : index
    %c0_10 = arith.constant 0 : index
    %5 = vector.load %arg2[%c0_9, %c0_10] : memref<16x64xf32, #tpu.memory_space<vmem>>, vector<16x64xf32>
    %cst = arith.constant dense<0.000000e+00> : vector<128x64xf32>
    %6 = tpu.matmul %0, %5, %cst {dimension_numbers = #tpu.dot_dimension_numbers<[1], [0], [0], [1], [0, 0, 1, 1], [], []>} : vector<128x16xf32>, vector<16x64xf32>, vector<128x64xf32> -> vector<128x64xf32>
    %7 = vector.broadcast %1 : vector<1x64xf32> to vector<128x64xf32>
    %8 = arith.addf %6, %7 : vector<128x64xf32>
    %9 = math.tanh %8 : vector<128x64xf32>
    %c0_11 = arith.constant 0 : index
    %c0_12 = arith.constant 0 : index
    %10 = vector.load %arg4[%c0_11, %c0_12] : memref<64x128xf32, #tpu.memory_space<vmem>>, vector<64x128xf32>
    %cst_13 = arith.constant dense<0.000000e+00> : vector<128x128xf32>
    %11 = tpu.matmul %9, %10, %cst_13 {dimension_numbers = #tpu.dot_dimension_numbers<[1], [0], [0], [1], [0, 0, 1, 1], [], []>} : vector<128x64xf32>, vector<64x128xf32>, vector<128x128xf32> -> vector<128x128xf32>
    %12 = vector.broadcast %2 : vector<1x128xf32> to vector<128x128xf32>
    %13 = arith.addf %11, %12 : vector<128x128xf32>
    %14 = math.tanh %13 : vector<128x128xf32>
    %15 = vector.broadcast %3 : vector<1x128xf32> to vector<128x128xf32>
    %16 = arith.mulf %14, %15 : vector<128x128xf32>
    %cst_14 = arith.constant dense<0.000000e+00> : vector<128xf32>
    %17 = vector.multi_reduction <add>, %16, %cst_14 [1] : vector<128x128xf32> to vector<128xf32>
    %18 = vector.shape_cast %17 : vector<128xf32> to vector<128x1xf32>
    %19 = vector.broadcast %4 : vector<1x1xf32> to vector<128x1xf32>
    %20 = arith.addf %18, %19 : vector<128x1xf32>
    %c0_15 = arith.constant 0 : index
    %c0_16 = arith.constant 0 : index
    %21 = vector.load %arg9[%c0_15, %c0_16] : memref<128x1xf32, #tpu.memory_space<vmem>>, vector<128x1xf32>
    tpu.vector_store %arg9[%c0_15, %c0_16], %20 {strides = array<i32>} : memref<128x1xf32, #tpu.memory_space<vmem>>, vector<128x1xf32>,
    %c0_17 = arith.constant 0 : index
    %c0_18 = arith.constant 0 : index
    %22 = vector.load %arg8[%c0_17, %c0_18] : memref<128x128xf32, #tpu.memory_space<vmem>>, vector<128x128xf32>
    tpu.vector_store %arg8[%c0_17, %c0_18], %14 {strides = array<i32>} : memref<128x128xf32, #tpu.memory_space<vmem>>, vector<128x128xf32>,
    return
  }
  func.func @transform_0(%arg0: i32) -> (i32, i32) {
    %c0_i32 = arith.constant 0 : i32
    %c0_i32_0 = arith.constant 0 : i32
    return %arg0, %c0_i32 : i32, i32
  }
  func.func @transform_1(%arg0: i32) -> (i32, i32) {
    %c0_i32 = arith.constant 0 : i32
    %c0_i32_0 = arith.constant 0 : i32
    %c0_i32_1 = arith.constant 0 : i32
    return %c0_i32, %c0_i32_0 : i32, i32
  }
  func.func @transform_2(%arg0: i32) -> (i32, i32) {
    %c0_i32 = arith.constant 0 : i32
    %c0_i32_0 = arith.constant 0 : i32
    %c0_i32_1 = arith.constant 0 : i32
    return %c0_i32, %c0_i32_0 : i32, i32
  }
  func.func @transform_3(%arg0: i32) -> (i32, i32) {
    %c0_i32 = arith.constant 0 : i32
    %c0_i32_0 = arith.constant 0 : i32
    %c0_i32_1 = arith.constant 0 : i32
    return %c0_i32, %c0_i32_0 : i32, i32
  }
  func.func @transform_4(%arg0: i32) -> (i32, i32) {
    %c0_i32 = arith.constant 0 : i32
    %c0_i32_0 = arith.constant 0 : i32
    %c0_i32_1 = arith.constant 0 : i32
    return %c0_i32, %c0_i32_0 : i32, i32
  }
  func.func @transform_5(%arg0: i32) -> (i32, i32) {
    %c0_i32 = arith.constant 0 : i32
    %c0_i32_0 = arith.constant 0 : i32
    %c0_i32_1 = arith.constant 0 : i32
    return %c0_i32, %c0_i32_0 : i32, i32
  }
  func.func @transform_6(%arg0: i32) -> (i32, i32) {
    %c0_i32 = arith.constant 0 : i32
    %c0_i32_0 = arith.constant 0 : i32
    %c0_i32_1 = arith.constant 0 : i32
    return %c0_i32, %c0_i32_0 : i32, i32
  }
  func.func @transform_7(%arg0: i32) -> (i32, i32) {
    %c0_i32 = arith.constant 0 : i32
    %c0_i32_0 = arith.constant 0 : i32
    return %arg0, %c0_i32 : i32, i32
  }
  func.func @transform_8(%arg0: i32) -> (i32, i32) {
    %c0_i32 = arith.constant 0 : i32
    %c0_i32_0 = arith.constant 0 : i32
    return %arg0, %c0_i32 : i32, i32
  }
}

</mosaic_0001>

<bundles_post_ra>
// kernel: tpu_custom_call.1
= control target key start
LH: loop header
LB: loop body
LE: loop exit
PB: predicated region body
PF: predicated region fallthrough
CT: control target
= control target key end

     0   :  { %s1725_s0 = inlined_call_operand.vmem [shape: f32[256,16], index: 0, kind: input, shape index: {}]   ;;  %s1726_s1 = inlined_call_operand.vmem [shape: f32[16,64], index: 1, kind: input, shape index: {}]   ;;  %s1727_s2 = inlined_call_operand.vmem [shape: f32[1,64], index: 2, kind: input, shape index: {}]   ;;  %s1728_s3 = inlined_call_operand.vmem [shape: f32[64,128], index: 3, kind: input, shape index: {}]   ;;  %s1729_s4 = inlined_call_operand.vmem [shape: f32[1,128], index: 4, kind: input, shape index: {}]   ;;  %s1730_s5 = inlined_call_operand.vmem [shape: f32[1,128], index: 5, kind: input, shape index: {}]   ;;  %s1731_s6 = inlined_call_operand.<no memory space> [shape: f32[1,1], index: 6, kind: input, shape index: {}]   ;;  %s1732_s7 = inlined_call_operand.hbm [shape: f32[256,128], index: 7, kind: output, shape index: {0}]   ;;  %s1733_s8 = inlined_call_operand.vmem [shape: f32[256,1], index: 8, kind: output, shape index: {1}]  }
   0x1   :  { %v14_v0 = vstv %s1731_s6 }
   0x2   :  { %15 = vst [vmem:[#allocation2] sm:$0x1] %v14_v0 }
   0x3   :  { %16 = vsyncpa [#allocation4], 0 }
   0x4   :  { %18 = vsyncpa [#allocation4 + $0x1], 0  ;;  %s1413_s29 = smov 0   ;;  %s1415_s30 = smov 0  }
   0x5   :  { %s1417_s9 = smov 0   ;;  %s1419_s10 = smov 0  }
   0x6 LB: > { %s1434_s6 = sadd.s32 4294967295, %s1360_s10   ;;  %s1004_s11 = sadd.s32 4294967294, %s1360_s10   ;;  %s1360_s10 = sphi %s1419_s10, %s1739_s10   ;;  %s1356_s9 = sphi %s1417_s9, %s1738_s9   ;;  %s1352_s30 = sphi %s1415_s30, %s1737_s30   ;;  %s1348_s29 = sphi %s1413_s29, %s1736_s29  }
   0x7   : > { %s1438_s12 = sadd.s32 1, %s1360_s10   ;;  %s183_s13 = sadd.s32 1, %s1356_s9 }
   0x8   : > { %s180_s14 = ssub.s32 %s1360_s10, %s1438_s12  ;;  %p193_p0 = scmp.ne.s32.totalorder %s1356_s9, %s1352_s30 }
   0x9   : > { %p181_p1 = scmp.eq.s32.totalorder %s180_s14, 0  ;;  %p194_p2 = scmp.eq.s32.totalorder %s1434_s6, 1 }
   0xa   : > { %p199_p3 = scmp.ne.s32.totalorder %s1352_s30, %s1348_s29  ;;  %p200_p4 = scmp.eq.s32.totalorder %s1004_s11, 1 }
   0xb   : > { %s1449_s15 = scalar_select %p181_p1, %s1356_s9, %s183_s13  }
   0xc   : > { %p1451_p5 = por %p194_p2, %p193_p0  ;;  %p1455_p6 = por %p200_p4, %p199_p3 }
   0xd   : > { %p1007_p7 = scmp.ge.s32.totalorder %s1360_s10, 1  ;;  %p271_p8 = scmp.lt.s32.totalorder %s1360_s10, 3 }
   0xf   : > { %p272_p9 = pnand %p1007_p7, %p271_p8 }
  0x10   : > { %v343_v1 = vld [vmem:[%s1726_s1] sm:$0xff] (!%p272_p9)  ;;  %v344_v2 = vld [vmem:[%s1726_s1 + $0x8] sm:$0xff] (!%p272_p9)  ;;  %s1009_s22 = sshll.u32 (!%p272_p9), %s1434_s6, 4  ;;  %v563_v6 = vld [vmem:[%s1728_s3 + $0x10] sm:$0xff] (!%p272_p9)  ;;  %vm351_vm0 = vcmask (!%p272_p9), 130048   ;;  %vm575_vm1 = vcmask (!%p272_p9), 523264  }
  0x11   : > { %275 = sbr.rel (%p272_p9) target bundleno = 660 (0x294), region = 48  ;;  %v561_v3 = vld [vmem:[%s1728_s3] sm:$0xff] (!%p272_p9)  ;;  %v1165_v4 = vpack.c.bf16 (!%p272_p9), %v344_v2, %v343_v1  ;;  %p311_p10 = scmp.lt.s32.totalorder (!%p272_p9), %s1009_s22, 31  ;;  %v562_v5 = vld [vmem:[%s1728_s3 + $0x8] sm:$0xff] (!%p272_p9)  ;;  %v564_v7 = vld [vmem:[%s1728_s3 + $0x18] sm:$0xff] (!%p272_p9) }
  0x12   : > { %v1169_v8 = vpack.c.bf16 (!%p272_p9), %v562_v5, %v561_v3  ;;  %v1173_v9 = vpack.c.bf16 (!%p272_p9), %v564_v7, %v563_v6  ;;  %v565_v26 = vld [vmem:[%s1728_s3 + $0x20] sm:$0xff] (!%p272_p9)  ;;  %v566_v27 = vld [vmem:[%s1728_s3 + $0x28] sm:$0xff] (!%p272_p9)  ;;  %v567_v29 = vld [vmem:[%s1728_s3 + $0x30] sm:$0xff] (!%p272_p9)  ;;  %s300_s21 = sand.u32 (!%p272_p9), 1, %s1352_s30   ;;  %s1054_s27 = sshll.u32 (!%p272_p9), %s1434_s6, 11 }
  0x13   : > { %1166 = vmatprep.subr.bf16.mxu0 (!%p272_p9), %v1165_v4  ;;  %v1177_v28 = vpack.c.bf16 (!%p272_p9), %v566_v27, %v565_v26  ;;  %v568_v30 = vld [vmem:[%s1728_s3 + $0x38] sm:$0xff] (!%p272_p9)  ;;  %v1537_v32 = vld [vmem:[%s1727_s2] ss:$0 sm:$0xff] (!%p272_p9)  ;;  %s1008_s23 = sshll.u32 (!%p272_p9), %s300_s21, 7  ;;  %s1639_s18 = scalar_lea.hbm (!%p272_p9), %s1732_s7, %s1054_s27 }
  0x14   : > { %1168 = vmatpush3.bf16.msra.mxu0 (!%p272_p9), %v1165_v4  ;;  %1185 = vmatprep.subr.bf16.mxu1 (!%p272_p9), %v1169_v8  ;;  %v1181_v31 = vpack.c.bf16 (!%p272_p9), %v568_v30, %v567_v29  ;;  %v1588_v30 = vld [vmem:[%s1730_s5] ss:$0 sm:$0xff] (!%p272_p9)  ;;  %s1591_s26 = scalar_lea.vmem (!%p272_p9), [#allocation3], %s1008_s23  ;;  %s1645_s19 = scalar_lea.sflag (!%p272_p9), [#allocation4], %s300_s21 }
  0x15   : > { %1170 = vmatprep.subr.bf16.mxu0 (!%p272_p9), %v1169_v8  ;;  %1189 = vmatpush3.bf16.msra.mxu1 (!%p272_p9), %v1169_v8  ;;  %s913_s28 = sshll.u32 (!%p272_p9), %s1591_s26, 4  ;;  %s1362_s6 = smov (!%p272_p9), [#allocation3]   ;;  %s1641_s28 = int_to_ptr.vmem [resolvable:$true] %s913_s28 }
  0x16   : > { %1186 = vmatprep.subr.bf16.mxu1 (!%p272_p9), %v1173_v9  ;;  %s1302_s23 = sshll.u32 (!%p272_p9), %s1362_s6, 4  ;;  %s1303_s23 = int_to_ptr.vmem [resolvable:$false] %s1302_s23 }
  0x17   : > { %s1304_s24 = scalar_lea.vmem (!%p272_p9), %s1303_s23, 4096  ;;  %p1305_p0 = scmp.lt.s32.totalorder (!%p272_p9), %s1641_s28, %s1303_s23 }
  0x18   : > { %s1741_s22 = smov (!%p311_p10, %s1009_s22), 31 }
  0x19   : > { %s1010_s14 = sshll.u32 %s1741_s22, 3  ;;  %1190 = vmatpush3.bf16.msra.mxu1 %v1173_v9 }
  0x1a   : > { %s1488_s20 = scalar_lea.vmem %s1725_s0, %s1010_s14  ;;  %1187 = vmatprep.subr.bf16.mxu1 %v1177_v28 }
  0x1b   : > { %v323_v10 = vld [vmem:[%s1488_s20] sm:$0xff]  ;;  %v324_v11 = vld [vmem:[%s1488_s20 + $0x8] sm:$0xff]  ;;  %v325_v12 = vld [vmem:[%s1488_s20 + $0x10] sm:$0xff] }
  0x1c   : > { %1101 = vmatprep.mubr.msk.f32.mxu0 %vm351_vm0, %v323_v10  ;;  %v326_v13 = vld [vmem:[%s1488_s20 + $0x18] sm:$0xff]  ;;  %v327_v14 = vld [vmem:[%s1488_s20 + $0x20] sm:$0xff]  ;;  %v328_v15 = vld [vmem:[%s1488_s20 + $0x28] sm:$0xff] }
  0x1d   : > { %1102 = vmatmul.mubr.msk.f32.vlgmr.msra.gmra.mrb[0].mxu0 %vm351_vm0, %v324_v11  ;;  %v329_v16 = vld [vmem:[%s1488_s20 + $0x30] sm:$0xff]  ;;  %v330_v17 = vld [vmem:[%s1488_s20 + $0x38] sm:$0xff]  ;;  %v331_v18 = vld [vmem:[%s1488_s20 + $0x40] sm:$0xff]  ;;  %1191 = vmatpush3.bf16.msra.mxu1 %v1177_v28 }
  0x1e   : > { %1104 = vmatprep.mubr.msk.f32.mxu0 %vm351_vm0, %v325_v12  ;;  %1172 = vmatpush3.bf16.msra.mxu0 %v1169_v8  ;;  %v332_v19 = vld [vmem:[%s1488_s20 + $0x48] sm:$0xff]  ;;  %v333_v20 = vld [vmem:[%s1488_s20 + $0x50] sm:$0xff]  ;;  %v334_v21 = vld [vmem:[%s1488_s20 + $0x58] sm:$0xff] }
  0x1f   : > { %1174 = vmatprep.subr.bf16.mxu0 %v1173_v9  ;;  %v335_v22 = vld [vmem:[%s1488_s20 + $0x60] sm:$0xff]  ;;  %v336_v23 = vld [vmem:[%s1488_s20 + $0x68] sm:$0xff]  ;;  %v337_v24 = vld [vmem:[%s1488_s20 + $0x70] sm:$0xff]  ;;  %1188 = vmatprep.subr.bf16.mxu1 %v1181_v31 }
  0x20   : > { %v338_v25 = vld [vmem:[%s1488_s20 + $0x78] sm:$0xff]  ;;  %s1298_s20 = scalar_lea.vmem %s1641_s28, 2048 }
  0x21   : > { %1105 = vmatmul.mubr.msk.f32.gmra.mrb[2].mxu0 %vm351_vm0, %v326_v13  ;;  %1192 = vmatpush3.bf16.msra.mxu1 %v1181_v31  ;;  %p1299_p11 = scmp.ne.s32.totalorder %s1641_s28, %s1298_s20  ;;  %p1306_p1 = scmp.lt.s32.totalorder %s1304_s24, %s1298_s20 }
  0x22   : > { %1107 = vmatprep.mubr.msk.f32.mxu0 %vm351_vm0, %v327_v14  ;;  %1176 = vmatpush3.bf16.msra.mxu0 %v1173_v9 }
  0x23   : > { %1178 = vmatprep.subr.bf16.mxu0 %v1177_v28  ;;  %p1300_p12 = pnand %p1299_p11, %p1451_p5  ;;  %p1307_p2 = por %p1306_p1, %p1305_p0 }
  0x25   : > { %1108 = vmatmul.mubr.msk.f32.gmra.mrb[4].mxu0 %vm351_vm0, %v328_v15  ;;  %p1301_p13 = pneg %p1300_p12 }
  0x26   : > { %1110 = vmatprep.mubr.msk.f32.mxu0 %vm351_vm0, %v329_v16  ;;  %1180 = vmatpush3.bf16.msra.mxu0 %v1177_v28 }
  0x27   : > { %1182 = vmatprep.subr.bf16.mxu0 %v1181_v31  ;;  %p1308_p3 = pnand %p1307_p2, %p1301_p13 }
  0x29   : > { %1111 = vmatmul.mubr.msk.f32.gmra.mrb[6].mxu0 %vm351_vm0, %v330_v17  ;;  %v1574_v17 = vld [vmem:[%s1729_s4] ss:$0 sm:$0xff] }
  0x2a   : > { %1113 = vmatprep.mubr.msk.f32.mxu0 %vm351_vm0, %v331_v18  ;;  %1184 = vmatpush3.bf16.msra.mxu0 %v1181_v31 }
  0x2d   : > { %1114 = vmatmul.mubr.msk.f32.gmra.mrb[8].mxu0 %vm351_vm0, %v332_v19 }
  0x2e   : > { %1116 = vmatprep.mubr.msk.f32.mxu0 %vm351_vm0, %v333_v20 }
  0x31   : > { %1117 = vmatmul.mubr.msk.f32.gmra.mrb[10].mxu0 %vm351_vm0, %v334_v21 }
  0x32   : > { %1119 = vmatprep.mubr.msk.f32.mxu0 %vm351_vm0, %v335_v22 }
  0x35   : > { %1120 = vmatmul.mubr.msk.f32.gmra.mrb[12].mxu0 %vm351_vm0, %v336_v23 }
  0x36   : > { %1122 = vmatprep.mubr.msk.f32.mxu0 %vm351_vm0, %v337_v24 }
  0x39   : > { %1123 = vmatmul.mubr.msk.f32.gmra.mrb[14].mxu0 %vm351_vm0, %v338_v25 }
  0xf0   : > { %v1103_v33 = vpop.f32.mrb[0].mxu0 }
  0xf1   : > { %v472_v34 = vadd.f32 %v1103_v33, %v1537_v32  ;;  %v466_v35 = vpop.f32.mrb[1].mxu0 }
  0xf2   : > { %v467_v36 = vadd.f32 %v1537_v32, %v466_v35 }
  0xf4   : > { %1234 = vtanh.f32 %v467_v36  ;;  %v1106_v37 = vpop.f32.mrb[2].mxu0 }
  0xf5   : > { %1236 = vtanh.f32 %v472_v34  ;;  %v482_v38 = vadd.f32 %v1106_v37, %v1537_v32  ;;  %v476_v39 = vpop.f32.mrb[3].mxu0 }
  0xf6   : > { %v477_v40 = vadd.f32 %v1537_v32, %v476_v39 }
  0xf8   : > { %1238 = vtanh.f32 %v477_v40  ;;  %v1109_v41 = vpop.f32.mrb[4].mxu0 }
  0xf9   : > { %1240 = vtanh.f32 %v482_v38  ;;  %v492_v42 = vadd.f32 %v1109_v41, %v1537_v32  ;;  %v486_v43 = vpop.f32.mrb[5].mxu0 }
  0xfa   : > { %v487_v44 = vadd.f32 %v1537_v32, %v486_v43 }
  0xfb   : > { %1242 = vtanh.f32 %v492_v42 }
  0xfc   : > { %1244 = vtanh.f32 %v487_v44  ;;  %v1112_v45 = vpop.f32.mrb[6].mxu0 }
  0xfd   : > { %v502_v46 = vadd.f32 %v1112_v45, %v1537_v32  ;;  %v496_v47 = vpop.f32.mrb[7].mxu0 }
  0xfe   : > { %v1235_v48 = vpop.eup %1234  ;;  %v497_v49 = vadd.f32 %v1537_v32, %v496_v47 }
  0xff   : > { %v1237_v50 = vpop.eup %1236  ;;  %1246 = vtanh.f32 %v502_v46  ;;  %1141 = vmatprep.mubr.msk.f32.mxu0 %vm575_vm1, %v1235_v48 }
 0x100   : > { %1248 = vtanh.f32 %v497_v49  ;;  %v1115_v51 = vpop.f32.mrb[8].mxu0  ;;  %1142 = vmatmul.mubr.msk.f32.vlgmr.msra.gmra.mrb[16].mxu0 %vm575_vm1, %v1237_v50 }
 0x101   : > { %v512_v52 = vadd.f32 %v1115_v51, %v1537_v32  ;;  %v506_v53 = vpop.f32.mrb[9].mxu0 }
 0x102   : > { %v1239_v54 = vpop.eup %1238  ;;  %v507_v55 = vadd.f32 %v1537_v32, %v506_v53 }
 0x103   : > { %v1241_v56 = vpop.eup %1240  ;;  %1250 = vtanh.f32 %v512_v52  ;;  %1144 = vmatprep.mubr.msk.f32.mxu1 %vm575_vm1, %v1239_v54 }
 0x104   : > { %1252 = vtanh.f32 %v507_v55  ;;  %v1118_v57 = vpop.f32.mrb[10].mxu0  ;;  %1145 = vmatmul.mubr.msk.f32.vlgmr.msra.gmra.mrb[0].mxu1 %vm575_vm1, %v1241_v56 }
 0x105   : > { %v1243_v58 = vpop.eup %1242  ;;  %v522_v59 = vadd.f32 %v1118_v57, %v1537_v32  ;;  %v516_v60 = vpop.f32.mrb[11].mxu0 }
 0x106   : > { %v1245_v61 = vpop.eup %1244  ;;  %v517_v62 = vadd.f32 %v1537_v32, %v516_v60 }
 0x107   : > { %1254 = vtanh.f32 %v522_v59  ;;  %1147 = vmatprep.mubr.msk.f32.mxu1 %vm575_vm1, %v1245_v61 }
 0x108   : > { %1256 = vtanh.f32 %v517_v62  ;;  %v1121_v63 = vpop.f32.mrb[12].mxu0  ;;  %1148 = vmatmul.mubr.msk.f32.gmra.mrb[2].mxu1 %vm575_vm1, %v1243_v58 }
 0x109   : > { %v1247_v0 = vpop.eup %1246  ;;  %v532_v1 = vadd.f32 %v1121_v63, %v1537_v32  ;;  %v526_v2 = vpop.f32.mrb[13].mxu0 }
 0x10a   : > { %v1249_v3 = vpop.eup %1248  ;;  %v527_v4 = vadd.f32 %v1537_v32, %v526_v2 }
 0x10b   : > { %1258 = vtanh.f32 %v532_v1  ;;  %1150 = vmatprep.mubr.msk.f32.mxu1 %vm575_vm1, %v1249_v3 }
 0x10c   : > { %1260 = vtanh.f32 %v527_v4  ;;  %v1124_v5 = vpop.f32.mrb[14].mxu0  ;;  %1151 = vmatmul.mubr.msk.f32.gmra.mrb[4].mxu1 %vm575_vm1, %v1247_v0 }
 0x10d   : > { %v1251_v6 = vpop.eup %1250  ;;  %v542_v7 = vadd.f32 %v1124_v5, %v1537_v32  ;;  %v536_v8 = vpop.f32.mrb[15].mxu0 }
 0x10e   : > { %v1253_v9 = vpop.eup %1252  ;;  %v537_v10 = vadd.f32 %v1537_v32, %v536_v8 }
 0x10f   : > { %1262 = vtanh.f32 %v542_v7  ;;  %1153 = vmatprep.mubr.msk.f32.mxu1 %vm575_vm1, %v1253_v9 }
 0x110   : > { %1264 = vtanh.f32 %v537_v10  ;;  %1154 = vmatmul.mubr.msk.f32.gmra.mrb[6].mxu1 %vm575_vm1, %v1251_v6 }
 0x111   : > { %v1255_v11 = vpop.eup %1254 }
 0x112   : > { %v1257_v12 = vpop.eup %1256 }
 0x113   : > { %1156 = vmatprep.mubr.msk.f32.mxu1 %vm575_vm1, %v1257_v12 }
 0x114   : > { %1157 = vmatmul.mubr.msk.f32.gmra.mrb[8].mxu1 %vm575_vm1, %v1255_v11 }
 0x115   : > { %v1259_v13 = vpop.eup %1258 }
 0x116   : > { %v1261_v14 = vpop.eup %1260 }
 0x117   : > { %1159 = vmatprep.mubr.msk.f32.mxu1 %vm575_vm1, %v1261_v14 }
 0x118   : > { %1160 = vmatmul.mubr.msk.f32.gmra.mrb[10].mxu1 %vm575_vm1, %v1259_v13 }
 0x119   : > { %v1263_v15 = vpop.eup %1262 }
 0x11a   : > { %v1265_v16 = vpop.eup %1264 }
 0x11b   : > { %1162 = vmatprep.mubr.msk.f32.mxu1 %vm575_vm1, %v1265_v16 }
 0x11c   : > { %1163 = vmatmul.mubr.msk.f32.gmra.mrb[12].mxu1 %vm575_vm1, %v1263_v15 }
 0x1d3   : > { %v1143_v18 = vpop.f32.mrb[16].mxu0 }
 0x1d4   : > { %v696_v19 = vadd.f32 %v1143_v18, %v1574_v17  ;;  %v690_v20 = vpop.f32.mrb[17].mxu0 }
 0x1d5   : > { %v691_v21 = vadd.f32 %v1574_v17, %v690_v20 }
 0x1d6   : > { %1266 = vtanh.f32 %v696_v19 }
 0x1d7   : > { %1268 = vtanh.f32 %v691_v21  ;;  %v1146_v22 = vpop.f32.mrb[0].mxu1 }
 0x1d8   : > { %v706_v23 = vadd.f32 %v1146_v22, %v1574_v17  ;;  %v700_v24 = vpop.f32.mrb[1].mxu1 }
 0x1d9   : > { %v701_v25 = vadd.f32 %v1574_v17, %v700_v24 }
 0x1da   : > { %1270 = vtanh.f32 %v706_v23 }
 0x1db   : > { %1272 = vtanh.f32 %v701_v25  ;;  %v1149_v26 = vpop.f32.mrb[2].mxu1 }
 0x1dc   : > { %v716_v27 = vadd.f32 %v1149_v26, %v1574_v17  ;;  %v710_v28 = vpop.f32.mrb[3].mxu1 }
 0x1dd   : > { %v711_v29 = vadd.f32 %v1574_v17, %v710_v28 }
 0x1de   : > { %1274 = vtanh.f32 %v716_v27 }
 0x1df   : > { %1276 = vtanh.f32 %v711_v29  ;;  %v1152_v31 = vpop.f32.mrb[4].mxu1 }
 0x1e0   : > { %v1267_v32 = vpop.eup %1266  ;;  %v726_v33 = vadd.f32 %v1152_v31, %v1574_v17  ;;  %v720_v34 = vpop.f32.mrb[5].mxu1 }
 0x1e1   : > { %v1269_v35 = vpop.eup %1268  ;;  %879 = vst [vmem:[%s1591_s26 + $0x8] sm:$0xff] %v1267_v32  ;;  %v721_v36 = vadd.f32 %v1574_v17, %v720_v34  ;;  %v792_v37 = vmul.f32 %v1267_v32, %v1588_v30 }
 0x1e2   : > { %878 = vst [vmem:[%s1591_s26] sm:$0xff] %v1269_v35  ;;  %1278 = vtanh.f32 %v726_v33  ;;  %v791_v45 = vmul.f32 %v1269_v35, %v1588_v30 }
 0x1e3   : > { %1280 = vtanh.f32 %v721_v36  ;;  %v1155_v38 = vpop.f32.mrb[6].mxu1  ;;  %809 = vadd.xlane.f32.xlu0 %v792_v37 }
 0x1e4   : > { %v1271_v39 = vpop.eup %1270  ;;  %v736_v40 = vadd.f32 %v1155_v38, %v1574_v17  ;;  %v730_v41 = vpop.f32.mrb[7].mxu1 }
 0x1e5   : > { %v1273_v42 = vpop.eup %1272  ;;  %881 = vst [vmem:[%s1591_s26 + $0x18] sm:$0xff] %v1271_v39  ;;  %v731_v43 = vadd.f32 %v1574_v17, %v730_v41  ;;  %v794_v44 = vmul.f32 %v1271_v39, %v1588_v30 }
 0x1e6   : > { %880 = vst [vmem:[%s1591_s26 + $0x10] sm:$0xff] %v1273_v42  ;;  %1282 = vtanh.f32 %v736_v40  ;;  %v793_v52 = vmul.f32 %v1273_v42, %v1588_v30 }
 0x1e7   : > { %1284 = vtanh.f32 %v731_v43  ;;  %813 = vadd.xlane.f32.xlu1 %v794_v44  ;;  %v1158_v46 = vpop.f32.mrb[8].mxu1  ;;  %807 = vadd.xlane.f32.xlu0 %v791_v45 }
 0x1e8   : > { %v1275_v47 = vpop.eup %1274  ;;  %v746_v48 = vadd.f32 %v1158_v46, %v1574_v17  ;;  %v740_v49 = vpop.f32.mrb[9].mxu1 }
 0x1e9   : > { %v1277_v50 = vpop.eup %1276  ;;  %883 = vst [vmem:[%s1591_s26 + $0x28] sm:$0xff] %v1275_v47  ;;  %v741_v51 = vadd.f32 %v1574_v17, %v740_v49  ;;  %v796_v60 = vmul.f32 %v1275_v47, %v1588_v30 }
 0x1ea   : > { %882 = vst [vmem:[%s1591_s26 + $0x20] sm:$0xff] %v1277_v50  ;;  %1286 = vtanh.f32 %v746_v48  ;;  %v795_v53 = vmul.f32 %v1277_v50, %v1588_v30 }
 0x1eb   : > { %1288 = vtanh.f32 %v741_v51  ;;  %v1161_v54 = vpop.f32.mrb[10].mxu1  ;;  %811 = vadd.xlane.f32.xlu1 %v793_v52 }
 0x1ec   : > { %v1279_v55 = vpop.eup %1278  ;;  %v756_v56 = vadd.f32 %v1161_v54, %v1574_v17  ;;  %v750_v57 = vpop.f32.mrb[11].mxu1  ;;  %815 = vadd.xlane.f32.xlu0 %v795_v53 }
 0x1ed   : > { %v1281_v58 = vpop.eup %1280  ;;  %885 = vst [vmem:[%s1591_s26 + $0x38] sm:$0xff] %v1279_v55  ;;  %v751_v59 = vadd.f32 %v1574_v17, %v750_v57  ;;  %v798_v4 = vmul.f32 %v1279_v55, %v1588_v30 }
 0x1ee   : > { %884 = vst [vmem:[%s1591_s26 + $0x30] sm:$0xff] %v1281_v58  ;;  %1290 = vtanh.f32 %v756_v56  ;;  %v797_v61 = vmul.f32 %v1281_v58, %v1588_v30 }
 0x1ef   : > { %1292 = vtanh.f32 %v751_v59  ;;  %v1164_v62 = vpop.f32.mrb[12].mxu1  ;;  %817 = vadd.xlane.f32.xlu1 %v796_v60 }
 0x1f0   : > { %v1283_v63 = vpop.eup %1282  ;;  %v766_v0 = vadd.f32 %v1164_v62, %v1574_v17  ;;  %v760_v1 = vpop.f32.mrb[13].mxu1  ;;  %819 = vadd.xlane.f32.xlu0 %v797_v61 }
 0x1f1   : > { %v1285_v2 = vpop.eup %1284  ;;  %887 = vst [vmem:[%s1591_s26 + $0x48] sm:$0xff] %v1283_v63  ;;  %v761_v3 = vadd.f32 %v1574_v17, %v760_v1  ;;  %v800_v8 = vmul.f32 %v1283_v63, %v1588_v30 }
 0x1f2   : > { %886 = vst [vmem:[%s1591_s26 + $0x40] sm:$0xff] %v1285_v2  ;;  %1294 = vtanh.f32 %v766_v0  ;;  %v799_v5 = vmul.f32 %v1285_v2, %v1588_v30 }
 0x1f3   : > { %1296 = vtanh.f32 %v761_v3  ;;  %821 = vadd.xlane.f32.xlu1 %v798_v4 }
 0x1f4   : > { %v1287_v6 = vpop.eup %1286  ;;  %823 = vadd.xlane.f32.xlu0 %v799_v5 }
 0x1f5   : > { %v1289_v7 = vpop.eup %1288  ;;  %889 = vst [vmem:[%s1591_s26 + $0x58] sm:$0xff] %v1287_v6  ;;  %v802_v12 = vmul.f32 %v1287_v6, %v1588_v30 }
 0x1f6   : > { %888 = vst [vmem:[%s1591_s26 + $0x50] sm:$0xff] %v1289_v7  ;;  %v801_v9 = vmul.f32 %v1289_v7, %v1588_v30 }
 0x1f7   : > { %825 = vadd.xlane.f32.xlu1 %v800_v8 }
 0x1f8   : > { %v1291_v10 = vpop.eup %1290  ;;  %827 = vadd.xlane.f32.xlu0 %v801_v9 }
 0x1f9   : > { %v1293_v11 = vpop.eup %1292  ;;  %891 = vst [vmem:[%s1591_s26 + $0x68] sm:$0xff] %v1291_v10  ;;  %v804_v16 = vmul.f32 %v1291_v10, %v1588_v30 }
 0x1fa   : > { %890 = vst [vmem:[%s1591_s26 + $0x60] sm:$0xff] %v1293_v11  ;;  %v803_v13 = vmul.f32 %v1293_v11, %v1588_v30 }
 0x1fb   : > { %829 = vadd.xlane.f32.xlu1 %v802_v12 }
 0x1fc   : > { %v1295_v14 = vpop.eup %1294  ;;  %831 = vadd.xlane.f32.xlu0 %v803_v13 }
 0x1fd   : > { %v1297_v15 = vpop.eup %1296  ;;  %893 = vst [vmem:[%s1591_s26 + $0x78] sm:$0xff] %v1295_v14  ;;  %v806_v18 = vmul.f32 %v1295_v14, %v1588_v30 }
 0x1fe   : > { %892 = vst [vmem:[%s1591_s26 + $0x70] sm:$0xff] %v1297_v15  ;;  %v805_v17 = vmul.f32 %v1297_v15, %v1588_v30 }
 0x1ff   : > { %833 = vadd.xlane.f32.xlu1 %v804_v16 }
 0x200   : > { %835 = vadd.xlane.f32.xlu0 %v805_v17 }
 0x203   : > { %837 = vadd.xlane.f32.xlu1 %v806_v18 }
 0x204   : > { %1311 = shalt.err (!%p1308_p3)
}
 0x205   : > { %s1312_s21 = scalar_lea.hbm %s1639_s18, 2048  ;;  %s1316_s27 = scalar_lea.hbm %s1732_s7, 4096 }
 0x206   : > { %p1313_p4 = scmp.ne.s32.totalorder %s1639_s18, %s1312_s21  ;;  %p1317_p9 = scmp.lt.u32.totalorder %s1639_s18, %s1732_s7 }
 0x207   : > { %p1318_p10 = scmp.lt.u32.totalorder %s1316_s27, %s1312_s21  ;;  %p1320_p12 = scmp.lt.u32.totalorder %s1312_s21, %s1639_s18 }
 0x208   : > { %p1314_p7 = pnand %p1313_p4, %p1451_p5 }
 0x209   : > { %p1319_p11 = por %p1318_p10, %p1317_p9 }
 0x20a   : > { %p1315_p8 = pneg %p1314_p7 }
 0x20b   : > { %p1321_p13 = por %p1320_p12, %p1319_p11 }
 0x20d   : > { %p1322_p0 = pnand %p1321_p13, %p1315_p8 }
 0x20f   : > { %1325 = shalt.err (!%p1322_p0)
}
 0x210   : > { %s1363_s20 = smov 128   ;;  %s1364_s6 = smov 8   ;;  %v1048_v19 = vld [vmem:[#allocation2] ss:$0 sm:$0xff]  ;;  %vm861_vm2 = vcmask 7168  }
 0x211   : > { %1193 = dma.vmem_to_hbm [thread:$0]  (%p1451_p5), %s1641_s28, 2048, %s1639_s18, %s1645_s19, %s1363_s20, %s1363_s20, %s1364_s6  }
 0x212   : > { %s1674_s25 = scalar_lea.vmem %s1733_s8, %s1010_s14 }
 0x270   : > { %v810_v20 = vpop.xlane.xlu0 %809 }
 0x271   : > { %v846_v21 = vadd.f32 %v1048_v19, %v810_v20 }
 0x273   : > { %863 = vst.msk [vmem:[%s1674_s25 + $0x8] sm:$0xff] %vm861_vm2, %v846_v21 }
 0x274   : > { %v814_v22 = vpop.xlane.xlu1 %813  ;;  %v808_v23 = vpop.xlane.xlu0 %807 }
 0x275   : > { %v848_v24 = vadd.f32 %v1048_v19, %v814_v22  ;;  %v845_v25 = vadd.f32 %v1048_v19, %v808_v23 }
 0x277   : > { %865 = vst.msk [vmem:[%s1674_s25 + $0x18] sm:$0xff] %vm861_vm2, %v848_v24  ;;  %862 = vst.msk [vmem:[%s1674_s25] sm:$0xff] %vm861_vm2, %v845_v25 }
 0x278   : > { %v812_v26 = vpop.xlane.xlu1 %811 }
 0x279   : > { %v847_v27 = vadd.f32 %v1048_v19, %v812_v26  ;;  %v816_v28 = vpop.xlane.xlu0 %815 }
 0x27a   : > { %v849_v29 = vadd.f32 %v1048_v19, %v816_v28 }
 0x27b   : > { %864 = vst.msk [vmem:[%s1674_s25 + $0x10] sm:$0xff] %vm861_vm2, %v847_v27 }
 0x27c   : > { %866 = vst.msk [vmem:[%s1674_s25 + $0x20] sm:$0xff] %vm861_vm2, %v849_v29  ;;  %v818_v30 = vpop.xlane.xlu1 %817 }
 0x27d   : > { %v850_v31 = vadd.f32 %v1048_v19, %v818_v30  ;;  %v820_v32 = vpop.xlane.xlu0 %819 }
 0x27e   : > { %v851_v33 = vadd.f32 %v1048_v19, %v820_v32 }
 0x27f   : > { %867 = vst.msk [vmem:[%s1674_s25 + $0x28] sm:$0xff] %vm861_vm2, %v850_v31 }
 0x280   : > { %868 = vst.msk [vmem:[%s1674_s25 + $0x30] sm:$0xff] %vm861_vm2, %v851_v33  ;;  %v822_v34 = vpop.xlane.xlu1 %821 }
 0x281   : > { %v852_v35 = vadd.f32 %v1048_v19, %v822_v34  ;;  %v824_v36 = vpop.xlane.xlu0 %823 }
 0x282   : > { %v853_v37 = vadd.f32 %v1048_v19, %v824_v36 }
 0x283   : > { %869 = vst.msk [vmem:[%s1674_s25 + $0x38] sm:$0xff] %vm861_vm2, %v852_v35 }
 0x284   : > { %870 = vst.msk [vmem:[%s1674_s25 + $0x40] sm:$0xff] %vm861_vm2, %v853_v37  ;;  %v826_v38 = vpop.xlane.xlu1 %825 }
 0x285   : > { %v854_v39 = vadd.f32 %v1048_v19, %v826_v38  ;;  %v828_v40 = vpop.xlane.xlu0 %827 }
 0x286   : > { %v855_v41 = vadd.f32 %v1048_v19, %v828_v40 }
 0x287   : > { %871 = vst.msk [vmem:[%s1674_s25 + $0x48] sm:$0xff] %vm861_vm2, %v854_v39 }
 0x288   : > { %872 = vst.msk [vmem:[%s1674_s25 + $0x50] sm:$0xff] %vm861_vm2, %v855_v41  ;;  %v830_v42 = vpop.xlane.xlu1 %829 }
 0x289   : > { %v856_v43 = vadd.f32 %v1048_v19, %v830_v42  ;;  %v832_v44 = vpop.xlane.xlu0 %831 }
 0x28a   : > { %v857_v45 = vadd.f32 %v1048_v19, %v832_v44 }
 0x28b   : > { %873 = vst.msk [vmem:[%s1674_s25 + $0x58] sm:$0xff] %vm861_vm2, %v856_v43 }
 0x28c   : > { %874 = vst.msk [vmem:[%s1674_s25 + $0x60] sm:$0xff] %vm861_vm2, %v857_v45  ;;  %v834_v46 = vpop.xlane.xlu1 %833 }
 0x28d   : > { %v858_v47 = vadd.f32 %v1048_v19, %v834_v46  ;;  %v836_v48 = vpop.xlane.xlu0 %835 }
 0x28e   : > { %v859_v49 = vadd.f32 %v1048_v19, %v836_v48 }
 0x28f   : > { %875 = vst.msk [vmem:[%s1674_s25 + $0x68] sm:$0xff] %vm861_vm2, %v858_v47 }
 0x290   : > { %876 = vst.msk [vmem:[%s1674_s25 + $0x70] sm:$0xff] %vm861_vm2, %v859_v49  ;;  %v838_v50 = vpop.xlane.xlu1 %837 }
 0x291   : > { %v860_v51 = vadd.f32 %v1048_v19, %v838_v50 }
 0x293   : > { %877 = vst.msk [vmem:[%s1674_s25 + $0x78] sm:$0xff] %vm861_vm2, %v860_v51 }
 0x294 PF: > { %p1199_p5 = scmp.ge.s32.totalorder %s1360_s10, 2  ;;  %s932_s16 = sand.u32 1, %s1348_s29  }
 0x295   : > { %s933_s22 = scalar_lea.sflag [#allocation4], %s932_s16 }
 0x296   : > { %p1196_p1 = pnand %p1199_p5, %p1455_p6 }
 0x298   : > { %1343 = dma.done.wait (!%p1196_p1), %s933_s22, 2048  }
 0x299   : > { %1345 = vsyncadd (!%p1196_p1), %s933_s22, 4294965248  ;;  %p21_p2 = scmp.ge.s32.totalorder %s1438_s12, 4   ;;  %s1736_s29 = smov %s1352_s30 }
 0x29a   : > { %s1737_s30 = smov %s1356_s9  ;;  %s1738_s9 = smov %s1449_s15 }
 0x29b   : > { %s1739_s10 = smov %s1438_s12  ;;  %23 = sbr.rel (!%p21_p2) target bundleno = 6 (0x6), region = 95 }
 0x2a2   :  { %946 = vsyncpa [#allocation4], 1 }
 0x2a3   :  { %948 = vsyncpa [#allocation4 + $0x1], 1 }

</bundles_post_ra>
